<compile_context>
chip_gen: v5e
topology: v5e:2x2
jax: 0.10.0
libtpu: 0.0.40
codegen_flags: <defaults>
</compile_context>

<pallas_src>
import jax
import jax.numpy as jnp
from jax.experimental import pallas as pl
from jax.experimental.pallas import tpu as pltpu


def _round_up(x: int, m: int) -> int:
    return (x + m - 1) // m * m


def _cast_scale_kernel(x_ref, o_ref):
    # x_ref: uint8 (block_rows, lanes) tile; o_ref: float32 (block_rows, lanes) tile.
    # True divide (not *1/255) to match torchvision's divide-by-255 to the ulp.
    o_ref[...] = x_ref[...].astype(jnp.float32) / jnp.float32(255.0)


def _cast_scale_flat(flat_u8: jax.Array, block_elems: int) -> jax.Array:
    """uint8 1-D byte stream -> float32 1-D stream scaled by 1/255 (same length)."""
    total = flat_u8.shape[0]

    # Lane width: widest lane-dense view that divides the byte count exactly
    # (bigger contiguous DMA bursts, and no pad/slice passes).
    if total % 512 == 0:
        lanes, padded = 512, total
    elif total % 128 == 0:
        lanes, padded = 128, total
    else:
        # Rare fallback (never hit for 32x32x3 images): pad only the tail.
        lanes = 128
        padded = _round_up(total, lanes)
        flat_u8 = jnp.pad(flat_u8, (0, padded - total))
    rows = padded // lanes

    # Block rows: multiple of 32 (uint8 native tile is (32, 128)) sized for
    # ~block_elems elements per step; if the whole array fits in one step,
    # use the full array as the (always-legal) block shape.
    block_rows = _round_up(max(1, block_elems // lanes), 32)
    if block_rows >= rows:
        block_rows = rows
    num_blocks = pl.cdiv(rows, block_rows)

    # Best-effort: even grid length splits cleanly across v7x's 2 TensorCores
    # (no-op on single-TC v5e/v6e).
    if num_blocks > 1 and num_blocks % 2 == 1:
        block_rows = _round_up(pl.cdiv(rows, num_blocks + 1), 32)
        num_blocks = pl.cdiv(rows, block_rows)

    out2d = pl.pallas_call(
        _cast_scale_kernel,
        out_shape=jax.ShapeDtypeStruct((rows, lanes), jnp.float32),
        grid=(num_blocks,),
        in_specs=[pl.BlockSpec((block_rows, lanes), lambda i: (i, 0))],
        out_specs=pl.BlockSpec((block_rows, lanes), lambda i: (i, 0)),
        compiler_params=pltpu.CompilerParams(
            dimension_semantics=("parallel",),
        ),
    )(flat_u8.reshape(rows, lanes))

    out = out2d.reshape(-1)
    return out[:total] if padded != total else out


def scripted_to_tensor(
    imgs_u8: jax.Array,
    *,
    block_elems: int = 2048 * 128,
    xla_fallback_below_bytes: int = 0,
) -> jax.Array:
    """uint8 HWC image(s) -> float32 CHW tensor(s) in [0, 1].

    Accepts (H, W, C) -> returns (C, H, W), or (N, H, W, C) -> returns (N, C, H, W).
    Set xla_fallback_below_bytes (e.g. 4<<20) to skip Pallas for tiny inputs
    where dispatch overhead dominates; default 0 always uses the kernel.
    """
    assert imgs_u8.dtype == jnp.uint8
    single = imgs_u8.ndim == 3
    if single:
        imgs_u8 = imgs_u8[None]
    N, H, W, C = imgs_u8.shape

    # HWC -> CHW permutation on the uint8 input (1 byte/elem); the kernel's
    # f32 output then lands directly in CHW layout.
    chw_u8 = jnp.transpose(imgs_u8, (0, 3, 1, 2))

    if chw_u8.size < xla_fallback_below_bytes:
        out = chw_u8.astype(jnp.float32) / jnp.float32(255.0)
    else:
        out = _cast_scale_flat(chw_u8.reshape(-1), block_elems).reshape(N, C, H, W)

    return out[0] if single else out


if __name__ == "__main__":
    key = jax.random.PRNGKey(0)
    # Small CIFAR-10-like batch: 64 images of 32x32x3 uint8 (~192 KB in).
    N, H, W, C = 64, 32, 32, 3
    imgs = jax.random.randint(key, (N, H, W, C), 0, 256, dtype=jnp.int32).astype(
        jnp.uint8
    )

    out = jax.block_until_ready(scripted_to_tensor(imgs))

    # Reference check (plain JAX).
    ref = jnp.transpose(imgs, (0, 3, 1, 2)).astype(jnp.float32) / 255.0
    assert out.shape == (N, C, H, W)
    assert out.dtype == jnp.float32
    assert jnp.max(jnp.abs(out - ref)) < 1e-6

    # Single-image path matches the original nn.Module forward: (H,W,C) -> (C,H,W).
    single = jax.block_until_ready(scripted_to_tensor(imgs[0]))
    assert single.shape == (C, H, W)
    assert single.dtype == jnp.float32
    assert jnp.max(jnp.abs(single - ref[0])) < 1e-6

    print("KERNEL_OK")
</pallas_src>

<mosaic_0001>
module attributes {stable_mosaic.version = 11 : i64} {
  func.func @_cast_scale_kernel(%arg0: i32, %arg1: memref<384x512xi8, #tpu.memory_space<vmem>>, %arg2: memref<384x512xf32, #tpu.memory_space<vmem>>) attributes {dimension_semantics = [#tpu.dimension_semantics<parallel>], iteration_bounds = array<i64: 1>, scalar_prefetch = 0 : i64, scratch_operands = 0 : i64, tpu.core_type = #tpu.core_type<tc>, window_params = [{transform_indices = @transform_0, window_bounds = array<i64: 384, 512>}, {transform_indices = @transform_1, window_bounds = array<i64: 384, 512>}]} {
    %c0 = arith.constant 0 : index
    %c0_0 = arith.constant 0 : index
    %0 = vector.load %arg1[%c0, %c0_0] : memref<384x512xi8, #tpu.memory_space<vmem>>, vector<384x512xi8>
    %1 = arith.uitofp %0 : vector<384x512xi8> to vector<384x512xf32>
    %cst = arith.constant 2.550000e+02 : f32
    %2 = vector.broadcast %cst : f32 to vector<384x512xf32>
    %3 = arith.divf %1, %2 : vector<384x512xf32>
    %c0_1 = arith.constant 0 : index
    %c0_2 = arith.constant 0 : index
    %4 = vector.load %arg2[%c0_1, %c0_2] : memref<384x512xf32, #tpu.memory_space<vmem>>, vector<384x512xf32>
    tpu.vector_store %arg2[%c0_1, %c0_2], %3 {strides = array<i32>} : memref<384x512xf32, #tpu.memory_space<vmem>>, vector<384x512xf32>,
    return
  }
  func.func @transform_0(%arg0: i32) -> (i32, i32) {
    %c0_i32 = arith.constant 0 : i32
    %c0_i32_0 = arith.constant 0 : i32
    return %arg0, %c0_i32 : i32, i32
  }
  func.func @transform_1(%arg0: i32) -> (i32, i32) {
    %c0_i32 = arith.constant 0 : i32
    %c0_i32_0 = arith.constant 0 : i32
    return %arg0, %c0_i32 : i32, i32
  }
}

</mosaic_0001>

<bundles_post_ra>
// kernel: tpu_custom_call.1
= control target key start
LH: loop header
LB: loop body
LE: loop exit
PB: predicated region body
PF: predicated region fallthrough
CT: control target
= control target key end

     0   :  { %6 = vsyncpa [#allocation3], 0  ;;  %s1615_s0 = inlined_call_operand.hbm [shape: u8[384,512], index: 0, kind: input, shape index: {}]   ;;  %s1616_s1 = inlined_call_operand.hbm [shape: f32[384,512], index: 1, kind: output, shape index: {}]  }
   0x1   :  { %7 = vsyncpa [#allocation4], 0  ;;  %s12_s8 = sshll.u32 %s1615_s0, 4  ;;  %s1118_s9 = smov [#allocation2]   ;;  %s13_s8 = int_to_ptr.hbm [resolvable:$true] %s12_s8 }
   0x2   :  { %s14_s10 = sshll.u32 %s1118_s9, 4  ;;  %s1119_s11 = smov 512   ;;  %s15_s10 = int_to_ptr.vmem [resolvable:$true] %s14_s10 }
   0x3   :  { %s1120_s12 = smov 32  }
   0x4   :  { %20 = dma.hbm_to_vmem [thread:$0]  %s13_s8, 6144, %s15_s10, [#allocation3], %s1119_s11, %s1119_s11, %s1120_s12  }
   0x5   :  { %1114 = dma.done.wait [#allocation3], 6144  }
   0x6   :  { %1115 = vsyncadd [#allocation3], 4294961152  ;;  %v1121_v0 = vmov 255.0   ;;  %v25_v2 = vld [vmem:[#allocation2] sm:$0xff]  ;;  %v26_v3 = vld [vmem:[#allocation2 + $0x8] sm:$0xff]  ;;  %s1122_s0 = smov [#allocation5]  }
   0x7   :  { %1064 = vrcp.f32 %v1121_v0  ;;  %v1139_v4 = vld [vmem:[#allocation2 + $0x10] sm:$0xff]  ;;  %v73_v5 = vunpack.c.0.s8 %v25_v2  ;;  %v74_v7 = vunpack.c.0.s8 %v26_v3  ;;  %v1141_v8 = vld [vmem:[#allocation2 + $0x18] sm:$0xff]  ;;  %v77_v11 = vunpack.c.1.s8 %v25_v2  ;;  %v1158_v55 = vld [vmem:[#allocation2 + $0x20] sm:$0xff]  ;;  %s1044_s13 = sshll.u32 %s1122_s0, 4  ;;  %s1046_s16 = sshll.u32 %s1616_s1, 4  ;;  %s1045_s13 = int_to_ptr.vmem [resolvable:$true] %s1044_s13  ;;  %s1047_s16 = int_to_ptr.hbm [resolvable:$true] %s1046_s16 }
   0x8   :  { %v75_v9 = vunpack.c.0.s8 %v1139_v4  ;;  %v76_v10 = vunpack.c.0.s8 %v1141_v8  ;;  %v78_v12 = vunpack.c.1.s8 %v26_v3  ;;  %v79_v16 = vunpack.c.1.s8 %v1139_v4  ;;  %v1163_v0 = vld [vmem:[#allocation2 + $0x28] sm:$0xff] }
   0x9   :  { %v265_v13 = vand.u32 255, %v73_v5  ;;  %v266_v15 = vand.u32 255, %v74_v7  ;;  %v269_v19 = vand.u32 255, %v77_v11  ;;  %v80_v30 = vunpack.c.1.s8 %v1141_v8 }
   0xa   :  { %v267_v17 = vand.u32 255, %v75_v9  ;;  %v268_v18 = vand.u32 255, %v76_v10  ;;  %v270_v20 = vand.u32 255, %v78_v12  ;;  %v271_v27 = vand.u32 255, %v79_v16 }
   0xb   :  { %v457_v21 = vcvt.s32.f32 %v265_v13  ;;  %v458_v23 = vcvt.s32.f32 %v266_v15  ;;  %v461_v26 = vcvt.s32.f32 %v269_v19  ;;  %v81_v31 = vunpack.c.2.s8 %v25_v2 }
   0xc   :  { %v459_v24 = vcvt.s32.f32 %v267_v17  ;;  %v460_v25 = vcvt.s32.f32 %v268_v18  ;;  %v462_v29 = vcvt.s32.f32 %v270_v20  ;;  %v82_v32 = vunpack.c.2.s8 %v26_v3 }
   0xd   :  { %v1065_v1 = vpop.eup %1064  ;;  %v83_v33 = vunpack.c.2.s8 %v1139_v4  ;;  %v84_v34 = vunpack.c.2.s8 %v1141_v8  ;;  %v85_v35 = vunpack.c.3.s8 %v25_v2  ;;  %v272_v37 = vand.u32 255, %v80_v30  ;;  %v1167_v2 = vld [vmem:[#allocation2 + $0x38] sm:$0xff] }
   0xe   :  { %v650_v6 = vmul.f32 255.0, %v1065_v1  ;;  %vm654_vm0 = vweird.f32 %v1065_v1  ;;  %v273_v38 = vand.u32 255, %v81_v31  ;;  %v86_v39 = vunpack.c.3.s8 %v26_v3 }
   0xf   :  { %v463_v43 = vcvt.s32.f32 %v271_v27  ;;  %v464_v46 = vcvt.s32.f32 %v272_v37  ;;  %v274_v48 = vand.u32 255, %v82_v32  ;;  %v275_v49 = vand.u32 255, %v83_v33 }
  0x10   :  { %v651_v14 = vsub.f32 1.0, %v650_v6  ;;  %v465_v47 = vcvt.s32.f32 %v273_v38  ;;  %v276_v50 = vand.u32 255, %v84_v34  ;;  %v277_v52 = vand.u32 255, %v85_v35 }
  0x11   :  { %v278_v53 = vand.u32 255, %v86_v39  ;;  %v87_v54 = vunpack.c.3.s8 %v1139_v4  ;;  %v466_v57 = vcvt.s32.f32 %v274_v48  ;;  %v467_v58 = vcvt.s32.f32 %v275_v49 }
  0x12   :  { %v652_v22 = vmul.f32 %v1065_v1, %v651_v14  ;;  %v468_v59 = vcvt.s32.f32 %v276_v50  ;;  %v469_v61 = vcvt.s32.f32 %v277_v52  ;;  %v88_v63 = vunpack.c.3.s8 %v1141_v8 }
  0x13   :  { %v279_v62 = vand.u32 255, %v87_v54  ;;  %v470_v5 = vcvt.s32.f32 %v278_v53  ;;  %v89_v6 = vunpack.c.0.s8 %v1158_v55  ;;  %v90_v12 = vunpack.c.0.s8 %v1163_v0 }
  0x14   :  { %v653_v28 = vadd.f32 %v1065_v1, %v652_v22  ;;  %v280_v10 = vand.u32 255, %v88_v63  ;;  %v92_v14 = vunpack.c.0.s8 %v1167_v2  ;;  %v93_v17 = vunpack.c.1.s8 %v1158_v55 }
  0x15   :  { %v471_v8 = vcvt.s32.f32 %v279_v62  ;;  %v281_v11 = vand.u32 255, %v89_v6  ;;  %v94_v18 = vunpack.c.1.s8 %v1163_v0  ;;  %v282_v20 = vand.u32 255, %v90_v12 }
  0x16   :  { %v1149_v36 = vsel %vm654_vm0, %v1065_v1, %v653_v28  ;;  %v1165_v1 = vld [vmem:[#allocation2 + $0x30] sm:$0xff]  ;;  %v472_v16 = vcvt.s32.f32 %v280_v10  ;;  %v284_v22 = vand.u32 255, %v92_v14  ;;  %v96_v34 = vunpack.c.1.s8 %v1167_v2 }
  0x17   :  { %v656_v40 = vmul.f32 %v1149_v36, %v457_v21  ;;  %v657_v41 = vmul.f32 %v1149_v36, %v458_v23  ;;  %v658_v42 = vmul.f32 %v1149_v36, %v459_v24  ;;  %v659_v44 = vmul.f32 %v1149_v36, %v460_v25 }
  0x18   :  { %v660_v45 = vmul.f32 %v1149_v36, %v461_v26  ;;  %v661_v51 = vmul.f32 %v1149_v36, %v462_v29  ;;  %v662_v56 = vmul.f32 %v1149_v36, %v463_v43  ;;  %v663_v60 = vmul.f32 %v1149_v36, %v464_v46 }
  0x19   :  { %848 = vst [vmem:[#allocation5] sm:$0xff] %v656_v40  ;;  %v664_v3 = vmul.f32 %v1149_v36, %v465_v47  ;;  %v665_v4 = vmul.f32 %v1149_v36, %v466_v57  ;;  %v666_v7 = vmul.f32 %v1149_v36, %v467_v58  ;;  %v667_v9 = vmul.f32 %v1149_v36, %v468_v59 }
  0x1a   :  { %849 = vst [vmem:[#allocation5 + $0x8] sm:$0xff] %v657_v41  ;;  %v91_v13 = vunpack.c.0.s8 %v1165_v1  ;;  %v668_v15 = vmul.f32 %v1149_v36, %v469_v61  ;;  %v473_v19 = vcvt.s32.f32 %v281_v11  ;;  %v669_v23 = vmul.f32 %v1149_v36, %v470_v5  ;;  %v1198_v61 = vld [vmem:[#allocation2 + $0x40] sm:$0xff] }
  0x1b   :  { %850 = vst [vmem:[#allocation5 + $0x10] sm:$0xff] %v658_v42  ;;  %v285_v24 = vand.u32 255, %v93_v17  ;;  %v286_v25 = vand.u32 255, %v94_v18  ;;  %v95_v26 = vunpack.c.1.s8 %v1165_v1  ;;  %v670_v27 = vmul.f32 %v1149_v36, %v471_v8 }
  0x1c   :  { %851 = vst [vmem:[#allocation5 + $0x18] sm:$0xff] %v659_v44  ;;  %v283_v21 = vand.u32 255, %v91_v13  ;;  %v474_v28 = vcvt.s32.f32 %v282_v20  ;;  %v476_v30 = vcvt.s32.f32 %v284_v22  ;;  %v671_v31 = vmul.f32 %v1149_v36, %v472_v16 }
  0x1d   :  { %852 = vst [vmem:[#allocation5 + $0x20] sm:$0xff] %v660_v45  ;;  %v477_v32 = vcvt.s32.f32 %v285_v24  ;;  %v287_v33 = vand.u32 255, %v95_v26  ;;  %v672_v35 = vmul.f32 %v1149_v36, %v473_v19  ;;  %v478_v38 = vcvt.s32.f32 %v286_v25 }
  0x1e   :  { %853 = vst [vmem:[#allocation5 + $0x28] sm:$0xff] %v661_v51  ;;  %v475_v29 = vcvt.s32.f32 %v283_v21  ;;  %v673_v37 = vmul.f32 %v1149_v36, %v474_v28  ;;  %v97_v39 = vunpack.c.2.s8 %v1158_v55  ;;  %v675_v41 = vmul.f32 %v1149_v36, %v476_v30 }
  0x1f   :  { %854 = vst [vmem:[#allocation5 + $0x30] sm:$0xff] %v662_v56  ;;  %v479_v42 = vcvt.s32.f32 %v287_v33  ;;  %v288_v43 = vand.u32 255, %v96_v34  ;;  %v98_v45 = vunpack.c.2.s8 %v1163_v0  ;;  %v99_v46 = vunpack.c.2.s8 %v1165_v1 }
  0x20   :  { %855 = vst [vmem:[#allocation5 + $0x38] sm:$0xff] %v663_v60  ;;  %v674_v40 = vmul.f32 %v1149_v36, %v475_v29  ;;  %v289_v44 = vand.u32 255, %v97_v39  ;;  %v100_v47 = vunpack.c.2.s8 %v1167_v2  ;;  %v676_v48 = vmul.f32 %v1149_v36, %v477_v32 }
  0x21   :  { %856 = vst [vmem:[#allocation5 + $0x40] sm:$0xff] %v664_v3  ;;  %v480_v49 = vcvt.s32.f32 %v288_v43  ;;  %v101_v50 = vunpack.c.3.s8 %v1158_v55  ;;  %v102_v51 = vunpack.c.3.s8 %v1163_v0  ;;  %v290_v53 = vand.u32 255, %v98_v45 }
  0x22   :  { %857 = vst [vmem:[#allocation5 + $0x48] sm:$0xff] %v665_v4  ;;  %v481_v52 = vcvt.s32.f32 %v289_v44  ;;  %v291_v54 = vand.u32 255, %v99_v46  ;;  %v292_v56 = vand.u32 255, %v100_v47  ;;  %v677_v57 = vmul.f32 %v1149_v36, %v478_v38 }
  0x23   :  { %858 = vst [vmem:[#allocation5 + $0x50] sm:$0xff] %v666_v7  ;;  %v293_v58 = vand.u32 255, %v101_v50  ;;  %v294_v59 = vand.u32 255, %v102_v51  ;;  %v103_v60 = vunpack.c.3.s8 %v1165_v1  ;;  %v678_v62 = vmul.f32 %v1149_v36, %v479_v42  ;;  %v1203_v7 = vld [vmem:[#allocation2 + $0x48] sm:$0xff]  ;;  %v1207_v1 = vld [vmem:[#allocation2 + $0x58] sm:$0xff] }
  0x24   :  { %859 = vst [vmem:[#allocation5 + $0x58] sm:$0xff] %v667_v9  ;;  %v482_v55 = vcvt.s32.f32 %v290_v53  ;;  %v483_v63 = vcvt.s32.f32 %v291_v54  ;;  %v484_v0 = vcvt.s32.f32 %v292_v56  ;;  %v679_v3 = vmul.f32 %v1149_v36, %v480_v49  ;;  %v1205_v9 = vld [vmem:[#allocation2 + $0x50] sm:$0xff] }
  0x25   :  { %860 = vst [vmem:[#allocation5 + $0x60] sm:$0xff] %v668_v15  ;;  %v485_v4 = vcvt.s32.f32 %v293_v58  ;;  %v295_v5 = vand.u32 255, %v103_v60  ;;  %v104_v6 = vunpack.c.3.s8 %v1167_v2  ;;  %v680_v8 = vmul.f32 %v1149_v36, %v481_v52 }
  0x26   :  { %861 = vst [vmem:[#allocation5 + $0x68] sm:$0xff] %v669_v23  ;;  %v681_v10 = vmul.f32 %v1149_v36, %v482_v55  ;;  %v486_v11 = vcvt.s32.f32 %v294_v59  ;;  %v105_v12 = vunpack.c.0.s8 %v1198_v61  ;;  %v682_v13 = vmul.f32 %v1149_v36, %v483_v63 }
  0x27   :  { %862 = vst [vmem:[#allocation5 + $0x70] sm:$0xff] %v670_v27  ;;  %v683_v14 = vmul.f32 %v1149_v36, %v484_v0  ;;  %v487_v2 = vcvt.s32.f32 %v295_v5  ;;  %v296_v15 = vand.u32 255, %v104_v6  ;;  %v106_v17 = vunpack.c.0.s8 %v1203_v7 }
  0x28   :  { %863 = vst [vmem:[#allocation5 + $0x78] sm:$0xff] %v671_v31  ;;  %v297_v16 = vand.u32 255, %v105_v12  ;;  %v107_v18 = vunpack.c.0.s8 %v1205_v9  ;;  %v108_v19 = vunpack.c.0.s8 %v1207_v1  ;;  %v684_v20 = vmul.f32 %v1149_v36, %v485_v4  ;;  %v1238_v4 = vld [vmem:[#allocation2 + $0x60] sm:$0xff] }
  0x29   :  { %864 = vst [vmem:[#allocation5 + $0x80] sm:$0xff] %v672_v35  ;;  %v488_v21 = vcvt.s32.f32 %v296_v15  ;;  %v109_v22 = vunpack.c.1.s8 %v1198_v61  ;;  %v110_v23 = vunpack.c.1.s8 %v1203_v7  ;;  %v298_v25 = vand.u32 255, %v106_v17 }
  0x2a   :  { %865 = vst [vmem:[#allocation5 + $0x88] sm:$0xff] %v673_v37  ;;  %v489_v24 = vcvt.s32.f32 %v297_v16  ;;  %v299_v26 = vand.u32 255, %v107_v18  ;;  %v300_v27 = vand.u32 255, %v108_v19  ;;  %v685_v28 = vmul.f32 %v1149_v36, %v486_v11 }
  0x2b   :  { %866 = vst [vmem:[#allocation5 + $0x90] sm:$0xff] %v674_v40  ;;  %v301_v29 = vand.u32 255, %v109_v22  ;;  %v302_v30 = vand.u32 255, %v110_v23  ;;  %v111_v31 = vunpack.c.1.s8 %v1205_v9  ;;  %v686_v32 = vmul.f32 %v1149_v36, %v487_v2 }
  0x2c   :  { %867 = vst [vmem:[#allocation5 + $0x98] sm:$0xff] %v675_v41  ;;  %v490_v33 = vcvt.s32.f32 %v298_v25  ;;  %v491_v34 = vcvt.s32.f32 %v299_v26  ;;  %v492_v35 = vcvt.s32.f32 %v300_v27  ;;  %v687_v37 = vmul.f32 %v1149_v36, %v488_v21 }
  0x2d   :  { %868 = vst [vmem:[#allocation5 + $0xa0] sm:$0xff] %v676_v48  ;;  %v493_v38 = vcvt.s32.f32 %v301_v29  ;;  %v303_v39 = vand.u32 255, %v111_v31  ;;  %v112_v40 = vunpack.c.1.s8 %v1207_v1  ;;  %v688_v41 = vmul.f32 %v1149_v36, %v489_v24 }
  0x2e   :  { %869 = vst [vmem:[#allocation5 + $0xa8] sm:$0xff] %v677_v57  ;;  %v689_v42 = vmul.f32 %v1149_v36, %v490_v33  ;;  %v494_v43 = vcvt.s32.f32 %v302_v30  ;;  %v113_v44 = vunpack.c.2.s8 %v1198_v61  ;;  %v690_v45 = vmul.f32 %v1149_v36, %v491_v34 }
  0x2f   :  { %870 = vst [vmem:[#allocation5 + $0xb0] sm:$0xff] %v678_v62  ;;  %v691_v46 = vmul.f32 %v1149_v36, %v492_v35  ;;  %v495_v47 = vcvt.s32.f32 %v303_v39  ;;  %v304_v48 = vand.u32 255, %v112_v40  ;;  %v114_v50 = vunpack.c.2.s8 %v1203_v7 }
  0x30   :  { %871 = vst [vmem:[#allocation5 + $0xb8] sm:$0xff] %v679_v3  ;;  %v305_v49 = vand.u32 255, %v113_v44  ;;  %v115_v51 = vunpack.c.2.s8 %v1205_v9  ;;  %v116_v52 = vunpack.c.2.s8 %v1207_v1  ;;  %v692_v53 = vmul.f32 %v1149_v36, %v493_v38 }
  0x31   :  { %872 = vst [vmem:[#allocation5 + $0xc0] sm:$0xff] %v680_v8  ;;  %v496_v54 = vcvt.s32.f32 %v304_v48  ;;  %v117_v56 = vunpack.c.3.s8 %v1198_v61  ;;  %v118_v57 = vunpack.c.3.s8 %v1203_v7  ;;  %v306_v59 = vand.u32 255, %v114_v50 }
  0x32   :  { %873 = vst [vmem:[#allocation5 + $0xc8] sm:$0xff] %v681_v10  ;;  %v497_v58 = vcvt.s32.f32 %v305_v49  ;;  %v307_v60 = vand.u32 255, %v115_v51  ;;  %v308_v62 = vand.u32 255, %v116_v52  ;;  %v693_v55 = vmul.f32 %v1149_v36, %v494_v43 }
  0x33   :  { %874 = vst [vmem:[#allocation5 + $0xd0] sm:$0xff] %v682_v13  ;;  %v309_v63 = vand.u32 255, %v117_v56  ;;  %v310_v0 = vand.u32 255, %v118_v57  ;;  %v119_v3 = vunpack.c.3.s8 %v1205_v9  ;;  %v694_v5 = vmul.f32 %v1149_v36, %v495_v47  ;;  %v1243_v13 = vld [vmem:[#allocation2 + $0x68] sm:$0xff]  ;;  %v1247_v9 = vld [vmem:[#allocation2 + $0x78] sm:$0xff] }
  0x34   :  { %875 = vst [vmem:[#allocation5 + $0xd8] sm:$0xff] %v683_v14  ;;  %v498_v61 = vcvt.s32.f32 %v306_v59  ;;  %v499_v6 = vcvt.s32.f32 %v307_v60  ;;  %v500_v7 = vcvt.s32.f32 %v308_v62  ;;  %v695_v8 = vmul.f32 %v1149_v36, %v496_v54  ;;  %v1245_v14 = vld [vmem:[#allocation2 + $0x70] sm:$0xff] }
  0x35   :  { %876 = vst [vmem:[#allocation5 + $0xe0] sm:$0xff] %v684_v20  ;;  %v501_v10 = vcvt.s32.f32 %v309_v63  ;;  %v311_v11 = vand.u32 255, %v119_v3  ;;  %v120_v12 = vunpack.c.3.s8 %v1207_v1  ;;  %v696_v2 = vmul.f32 %v1149_v36, %v497_v58 }
  0x36   :  { %877 = vst [vmem:[#allocation5 + $0xe8] sm:$0xff] %v685_v28  ;;  %v697_v15 = vmul.f32 %v1149_v36, %v498_v61  ;;  %v502_v16 = vcvt.s32.f32 %v310_v0  ;;  %v121_v17 = vunpack.c.0.s8 %v1238_v4  ;;  %v698_v18 = vmul.f32 %v1149_v36, %v499_v6 }
  0x37   :  { %878 = vst [vmem:[#allocation5 + $0xf0] sm:$0xff] %v686_v32  ;;  %v699_v19 = vmul.f32 %v1149_v36, %v500_v7  ;;  %v503_v1 = vcvt.s32.f32 %v311_v11  ;;  %v312_v20 = vand.u32 255, %v120_v12  ;;  %v122_v22 = vunpack.c.0.s8 %v1243_v13 }
  0x38   :  { %879 = vst [vmem:[#allocation5 + $0xf8] sm:$0xff] %v687_v37  ;;  %v313_v21 = vand.u32 255, %v121_v17  ;;  %v123_v23 = vunpack.c.0.s8 %v1245_v14  ;;  %v124_v24 = vunpack.c.0.s8 %v1247_v9  ;;  %v700_v25 = vmul.f32 %v1149_v36, %v501_v10  ;;  %v1278_v10 = vld [vmem:[#allocation2 + $0x80] sm:$0xff] }
  0x39   :  { %880 = vst [vmem:[#allocation5 + $0x100] sm:$0xff] %v688_v41  ;;  %v504_v26 = vcvt.s32.f32 %v312_v20  ;;  %v125_v27 = vunpack.c.1.s8 %v1238_v4  ;;  %v126_v28 = vunpack.c.1.s8 %v1243_v13  ;;  %v314_v30 = vand.u32 255, %v122_v22 }
  0x3a   :  { %881 = vst [vmem:[#allocation5 + $0x108] sm:$0xff] %v689_v42  ;;  %v505_v29 = vcvt.s32.f32 %v313_v21  ;;  %v315_v31 = vand.u32 255, %v123_v23  ;;  %v316_v32 = vand.u32 255, %v124_v24  ;;  %v701_v33 = vmul.f32 %v1149_v36, %v502_v16 }
  0x3b   :  { %882 = vst [vmem:[#allocation5 + $0x110] sm:$0xff] %v690_v45  ;;  %v317_v34 = vand.u32 255, %v125_v27  ;;  %v318_v35 = vand.u32 255, %v126_v28  ;;  %v127_v37 = vunpack.c.1.s8 %v1245_v14  ;;  %v702_v38 = vmul.f32 %v1149_v36, %v503_v1 }
  0x3c   :  { %883 = vst [vmem:[#allocation5 + $0x118] sm:$0xff] %v691_v46  ;;  %v506_v39 = vcvt.s32.f32 %v314_v30  ;;  %v507_v40 = vcvt.s32.f32 %v315_v31  ;;  %v508_v41 = vcvt.s32.f32 %v316_v32  ;;  %v703_v42 = vmul.f32 %v1149_v36, %v504_v26 }
  0x3d   :  { %884 = vst [vmem:[#allocation5 + $0x120] sm:$0xff] %v692_v53  ;;  %v509_v43 = vcvt.s32.f32 %v317_v34  ;;  %v319_v44 = vand.u32 255, %v127_v37  ;;  %v128_v45 = vunpack.c.1.s8 %v1247_v9  ;;  %v704_v46 = vmul.f32 %v1149_v36, %v505_v29 }
  0x3e   :  { %885 = vst [vmem:[#allocation5 + $0x128] sm:$0xff] %v693_v55  ;;  %v705_v47 = vmul.f32 %v1149_v36, %v506_v39  ;;  %v510_v48 = vcvt.s32.f32 %v318_v35  ;;  %v129_v49 = vunpack.c.2.s8 %v1238_v4  ;;  %v706_v50 = vmul.f32 %v1149_v36, %v507_v40 }
  0x3f   :  { %886 = vst [vmem:[#allocation5 + $0x130] sm:$0xff] %v694_v5  ;;  %v707_v51 = vmul.f32 %v1149_v36, %v508_v41  ;;  %v511_v52 = vcvt.s32.f32 %v319_v44  ;;  %v320_v53 = vand.u32 255, %v128_v45  ;;  %v130_v56 = vunpack.c.2.s8 %v1243_v13 }
  0x40   :  { %887 = vst [vmem:[#allocation5 + $0x138] sm:$0xff] %v695_v8  ;;  %v321_v54 = vand.u32 255, %v129_v49  ;;  %v131_v57 = vunpack.c.2.s8 %v1245_v14  ;;  %v132_v58 = vunpack.c.2.s8 %v1247_v9  ;;  %v708_v59 = vmul.f32 %v1149_v36, %v509_v43 }
  0x41   :  { %888 = vst [vmem:[#allocation5 + $0x140] sm:$0xff] %v696_v2  ;;  %v512_v60 = vcvt.s32.f32 %v320_v53  ;;  %v133_v62 = vunpack.c.3.s8 %v1238_v4  ;;  %v134_v55 = vunpack.c.3.s8 %v1243_v13  ;;  %v322_v0 = vand.u32 255, %v130_v56 }
  0x42   :  { %889 = vst [vmem:[#allocation5 + $0x148] sm:$0xff] %v697_v15  ;;  %v513_v63 = vcvt.s32.f32 %v321_v54  ;;  %v323_v3 = vand.u32 255, %v131_v57  ;;  %v324_v5 = vand.u32 255, %v132_v58  ;;  %v709_v61 = vmul.f32 %v1149_v36, %v510_v48 }
  0x43   :  { %890 = vst [vmem:[#allocation5 + $0x150] sm:$0xff] %v698_v18  ;;  %v325_v6 = vand.u32 255, %v133_v62  ;;  %v326_v7 = vand.u32 255, %v134_v55  ;;  %v135_v8 = vunpack.c.3.s8 %v1245_v14  ;;  %v710_v11 = vmul.f32 %v1149_v36, %v511_v52  ;;  %v1283_v18 = vld [vmem:[#allocation2 + $0x88] sm:$0xff]  ;;  %v1287_v14 = vld [vmem:[#allocation2 + $0x98] sm:$0xff] }
  0x44   :  { %891 = vst [vmem:[#allocation5 + $0x158] sm:$0xff] %v699_v19  ;;  %v514_v4 = vcvt.s32.f32 %v322_v0  ;;  %v515_v12 = vcvt.s32.f32 %v323_v3  ;;  %v516_v13 = vcvt.s32.f32 %v324_v5  ;;  %v711_v2 = vmul.f32 %v1149_v36, %v512_v60  ;;  %v1285_v19 = vld [vmem:[#allocation2 + $0x90] sm:$0xff] }
  0x45   :  { %892 = vst [vmem:[#allocation5 + $0x160] sm:$0xff] %v700_v25  ;;  %v517_v15 = vcvt.s32.f32 %v325_v6  ;;  %v327_v16 = vand.u32 255, %v135_v8  ;;  %v136_v17 = vunpack.c.3.s8 %v1247_v9  ;;  %v712_v1 = vmul.f32 %v1149_v36, %v513_v63 }
  0x46   :  { %893 = vst [vmem:[#allocation5 + $0x168] sm:$0xff] %v701_v33  ;;  %v713_v20 = vmul.f32 %v1149_v36, %v514_v4  ;;  %v518_v21 = vcvt.s32.f32 %v326_v7  ;;  %v137_v22 = vunpack.c.0.s8 %v1278_v10  ;;  %v714_v23 = vmul.f32 %v1149_v36, %v515_v12 }
  0x47   :  { %894 = vst [vmem:[#allocation5 + $0x170] sm:$0xff] %v702_v38  ;;  %v715_v24 = vmul.f32 %v1149_v36, %v516_v13  ;;  %v519_v9 = vcvt.s32.f32 %v327_v16  ;;  %v328_v25 = vand.u32 255, %v136_v17  ;;  %v138_v27 = vunpack.c.0.s8 %v1283_v18 }
  0x48   :  { %895 = vst [vmem:[#allocation5 + $0x178] sm:$0xff] %v703_v42  ;;  %v329_v26 = vand.u32 255, %v137_v22  ;;  %v139_v28 = vunpack.c.0.s8 %v1285_v19  ;;  %v140_v29 = vunpack.c.0.s8 %v1287_v14  ;;  %v716_v30 = vmul.f32 %v1149_v36, %v517_v15  ;;  %v1318_v15 = vld [vmem:[#allocation2 + $0xa0] sm:$0xff] }
  0x49   :  { %896 = vst [vmem:[#allocation5 + $0x180] sm:$0xff] %v704_v46  ;;  %v520_v31 = vcvt.s32.f32 %v328_v25  ;;  %v141_v32 = vunpack.c.1.s8 %v1278_v10  ;;  %v142_v33 = vunpack.c.1.s8 %v1283_v18  ;;  %v330_v35 = vand.u32 255, %v138_v27 }
  0x4a   :  { %897 = vst [vmem:[#allocation5 + $0x188] sm:$0xff] %v705_v47  ;;  %v521_v34 = vcvt.s32.f32 %v329_v26  ;;  %v331_v37 = vand.u32 255, %v139_v28  ;;  %v332_v38 = vand.u32 255, %v140_v29  ;;  %v717_v39 = vmul.f32 %v1149_v36, %v518_v21 }
  0x4b   :  { %898 = vst [vmem:[#allocation5 + $0x190] sm:$0xff] %v706_v50  ;;  %v333_v40 = vand.u32 255, %v141_v32  ;;  %v334_v41 = vand.u32 255, %v142_v33  ;;  %v143_v42 = vunpack.c.1.s8 %v1285_v19  ;;  %v718_v43 = vmul.f32 %v1149_v36, %v519_v9 }
  0x4c   :  { %899 = vst [vmem:[#allocation5 + $0x198] sm:$0xff] %v707_v51  ;;  %v522_v44 = vcvt.s32.f32 %v330_v35  ;;  %v523_v45 = vcvt.s32.f32 %v331_v37  ;;  %v524_v46 = vcvt.s32.f32 %v332_v38  ;;  %v719_v47 = vmul.f32 %v1149_v36, %v520_v31 }
  0x4d   :  { %900 = vst [vmem:[#allocation5 + $0x1a0] sm:$0xff] %v708_v59  ;;  %v525_v48 = vcvt.s32.f32 %v333_v40  ;;  %v335_v49 = vand.u32 255, %v143_v42  ;;  %v144_v50 = vunpack.c.1.s8 %v1287_v14  ;;  %v720_v51 = vmul.f32 %v1149_v36, %v521_v34 }
  0x4e   :  { %901 = vst [vmem:[#allocation5 + $0x1a8] sm:$0xff] %v709_v61  ;;  %v721_v52 = vmul.f32 %v1149_v36, %v522_v44  ;;  %v526_v53 = vcvt.s32.f32 %v334_v41  ;;  %v145_v54 = vunpack.c.2.s8 %v1278_v10  ;;  %v722_v56 = vmul.f32 %v1149_v36, %v523_v45 }
  0x4f   :  { %902 = vst [vmem:[#allocation5 + $0x1b0] sm:$0xff] %v710_v11  ;;  %v723_v57 = vmul.f32 %v1149_v36, %v524_v46  ;;  %v527_v58 = vcvt.s32.f32 %v335_v49  ;;  %v336_v59 = vand.u32 255, %v144_v50  ;;  %v146_v62 = vunpack.c.2.s8 %v1283_v18 }
  0x50   :  { %903 = vst [vmem:[#allocation5 + $0x1b8] sm:$0xff] %v711_v2  ;;  %v337_v60 = vand.u32 255, %v145_v54  ;;  %v147_v55 = vunpack.c.2.s8 %v1285_v19  ;;  %v148_v63 = vunpack.c.2.s8 %v1287_v14  ;;  %v724_v0 = vmul.f32 %v1149_v36, %v525_v48 }
  0x51   :  { %904 = vst [vmem:[#allocation5 + $0x1c0] sm:$0xff] %v712_v1  ;;  %v528_v3 = vcvt.s32.f32 %v336_v59  ;;  %v149_v5 = vunpack.c.3.s8 %v1278_v10  ;;  %v150_v61 = vunpack.c.3.s8 %v1283_v18  ;;  %v338_v7 = vand.u32 255, %v146_v62 }
  0x52   :  { %905 = vst [vmem:[#allocation5 + $0x1c8] sm:$0xff] %v713_v20  ;;  %v529_v6 = vcvt.s32.f32 %v337_v60  ;;  %v339_v8 = vand.u32 255, %v147_v55  ;;  %v340_v11 = vand.u32 255, %v148_v63  ;;  %v725_v4 = vmul.f32 %v1149_v36, %v526_v53 }
  0x53   :  { %906 = vst [vmem:[#allocation5 + $0x1d0] sm:$0xff] %v714_v23  ;;  %v341_v12 = vand.u32 255, %v149_v5  ;;  %v342_v13 = vand.u32 255, %v150_v61  ;;  %v151_v2 = vunpack.c.3.s8 %v1285_v19  ;;  %v726_v16 = vmul.f32 %v1149_v36, %v527_v58  ;;  %v1323_v23 = vld [vmem:[#allocation2 + $0xa8] sm:$0xff]  ;;  %v1327_v19 = vld [vmem:[#allocation2 + $0xb8] sm:$0xff] }
  0x54   :  { %907 = vst [vmem:[#allocation5 + $0x1d8] sm:$0xff] %v715_v24  ;;  %v530_v10 = vcvt.s32.f32 %v338_v7  ;;  %v531_v17 = vcvt.s32.f32 %v339_v8  ;;  %v532_v18 = vcvt.s32.f32 %v340_v11  ;;  %v727_v1 = vmul.f32 %v1149_v36, %v528_v3  ;;  %v1325_v24 = vld [vmem:[#allocation2 + $0xb0] sm:$0xff] }
  0x55   :  { %908 = vst [vmem:[#allocation5 + $0x1e0] sm:$0xff] %v716_v30  ;;  %v533_v20 = vcvt.s32.f32 %v341_v12  ;;  %v343_v21 = vand.u32 255, %v151_v2  ;;  %v152_v22 = vunpack.c.3.s8 %v1287_v14  ;;  %v728_v9 = vmul.f32 %v1149_v36, %v529_v6 }
  0x56   :  { %909 = vst [vmem:[#allocation5 + $0x1e8] sm:$0xff] %v717_v39  ;;  %v729_v25 = vmul.f32 %v1149_v36, %v530_v10  ;;  %v534_v26 = vcvt.s32.f32 %v342_v13  ;;  %v153_v27 = vunpack.c.0.s8 %v1318_v15  ;;  %v730_v28 = vmul.f32 %v1149_v36, %v531_v17 }
  0x57   :  { %910 = vst [vmem:[#allocation5 + $0x1f0] sm:$0xff] %v718_v43  ;;  %v731_v29 = vmul.f32 %v1149_v36, %v532_v18  ;;  %v535_v14 = vcvt.s32.f32 %v343_v21  ;;  %v344_v30 = vand.u32 255, %v152_v22  ;;  %v154_v32 = vunpack.c.0.s8 %v1323_v23 }
  0x58   :  { %911 = vst [vmem:[#allocation5 + $0x1f8] sm:$0xff] %v719_v47  ;;  %v345_v31 = vand.u32 255, %v153_v27  ;;  %v155_v33 = vunpack.c.0.s8 %v1325_v24  ;;  %v156_v34 = vunpack.c.0.s8 %v1327_v19  ;;  %v732_v35 = vmul.f32 %v1149_v36, %v533_v20  ;;  %v1358_v20 = vld [vmem:[#allocation2 + $0xc0] sm:$0xff] }
  0x59   :  { %912 = vst [vmem:[#allocation5 + $0x200] sm:$0xff] %v720_v51  ;;  %v536_v37 = vcvt.s32.f32 %v344_v30  ;;  %v157_v38 = vunpack.c.1.s8 %v1318_v15  ;;  %v158_v39 = vunpack.c.1.s8 %v1323_v23  ;;  %v346_v41 = vand.u32 255, %v154_v32 }
  0x5a   :  { %913 = vst [vmem:[#allocation5 + $0x208] sm:$0xff] %v721_v52  ;;  %v537_v40 = vcvt.s32.f32 %v345_v31  ;;  %v347_v42 = vand.u32 255, %v155_v33  ;;  %v348_v43 = vand.u32 255, %v156_v34  ;;  %v733_v44 = vmul.f32 %v1149_v36, %v534_v26 }
  0x5b   :  { %914 = vst [vmem:[#allocation5 + $0x210] sm:$0xff] %v722_v56  ;;  %v349_v45 = vand.u32 255, %v157_v38  ;;  %v350_v46 = vand.u32 255, %v158_v39  ;;  %v159_v47 = vunpack.c.1.s8 %v1325_v24  ;;  %v734_v48 = vmul.f32 %v1149_v36, %v535_v14 }
  0x5c   :  { %915 = vst [vmem:[#allocation5 + $0x218] sm:$0xff] %v723_v57  ;;  %v538_v49 = vcvt.s32.f32 %v346_v41  ;;  %v539_v50 = vcvt.s32.f32 %v347_v42  ;;  %v540_v51 = vcvt.s32.f32 %v348_v43  ;;  %v735_v52 = vmul.f32 %v1149_v36, %v536_v37 }
  0x5d   :  { %916 = vst [vmem:[#allocation5 + $0x220] sm:$0xff] %v724_v0  ;;  %v541_v53 = vcvt.s32.f32 %v349_v45  ;;  %v351_v54 = vand.u32 255, %v159_v47  ;;  %v160_v56 = vunpack.c.1.s8 %v1327_v19  ;;  %v736_v57 = vmul.f32 %v1149_v36, %v537_v40 }
  0x5e   :  { %917 = vst [vmem:[#allocation5 + $0x228] sm:$0xff] %v725_v4  ;;  %v737_v58 = vmul.f32 %v1149_v36, %v538_v49  ;;  %v542_v59 = vcvt.s32.f32 %v350_v46  ;;  %v161_v60 = vunpack.c.2.s8 %v1318_v15  ;;  %v738_v62 = vmul.f32 %v1149_v36, %v539_v50 }
  0x5f   :  { %918 = vst [vmem:[#allocation5 + $0x230] sm:$0xff] %v726_v16  ;;  %v739_v55 = vmul.f32 %v1149_v36, %v540_v51  ;;  %v543_v63 = vcvt.s32.f32 %v351_v54  ;;  %v352_v0 = vand.u32 255, %v160_v56  ;;  %v162_v5 = vunpack.c.2.s8 %v1323_v23 }
  0x60   :  { %919 = vst [vmem:[#allocation5 + $0x238] sm:$0xff] %v727_v1  ;;  %v353_v3 = vand.u32 255, %v161_v60  ;;  %v163_v61 = vunpack.c.2.s8 %v1325_v24  ;;  %v164_v6 = vunpack.c.2.s8 %v1327_v19  ;;  %v740_v7 = vmul.f32 %v1149_v36, %v541_v53 }
  0x61   :  { %920 = vst [vmem:[#allocation5 + $0x240] sm:$0xff] %v728_v9  ;;  %v544_v8 = vcvt.s32.f32 %v352_v0  ;;  %v165_v11 = vunpack.c.3.s8 %v1318_v15  ;;  %v166_v4 = vunpack.c.3.s8 %v1323_v23  ;;  %v354_v13 = vand.u32 255, %v162_v5 }
  0x62   :  { %921 = vst [vmem:[#allocation5 + $0x248] sm:$0xff] %v729_v25  ;;  %v545_v12 = vcvt.s32.f32 %v353_v3  ;;  %v355_v2 = vand.u32 255, %v163_v61  ;;  %v356_v16 = vand.u32 255, %v164_v6  ;;  %v741_v10 = vmul.f32 %v1149_v36, %v542_v59 }
  0x63   :  { %922 = vst [vmem:[#allocation5 + $0x250] sm:$0xff] %v730_v28  ;;  %v357_v17 = vand.u32 255, %v165_v11  ;;  %v358_v18 = vand.u32 255, %v166_v4  ;;  %v167_v1 = vunpack.c.3.s8 %v1325_v24  ;;  %v742_v21 = vmul.f32 %v1149_v36, %v543_v63  ;;  %v1363_v28 = vld [vmem:[#allocation2 + $0xc8] sm:$0xff]  ;;  %v1367_v24 = vld [vmem:[#allocation2 + $0xd8] sm:$0xff] }
  0x64   :  { %923 = vst [vmem:[#allocation5 + $0x258] sm:$0xff] %v731_v29  ;;  %v546_v15 = vcvt.s32.f32 %v354_v13  ;;  %v547_v22 = vcvt.s32.f32 %v355_v2  ;;  %v548_v23 = vcvt.s32.f32 %v356_v16  ;;  %v743_v9 = vmul.f32 %v1149_v36, %v544_v8  ;;  %v1365_v29 = vld [vmem:[#allocation2 + $0xd0] sm:$0xff] }
  0x65   :  { %924 = vst [vmem:[#allocation5 + $0x260] sm:$0xff] %v732_v35  ;;  %v549_v25 = vcvt.s32.f32 %v357_v17  ;;  %v359_v26 = vand.u32 255, %v167_v1  ;;  %v168_v27 = vunpack.c.3.s8 %v1327_v19  ;;  %v744_v14 = vmul.f32 %v1149_v36, %v545_v12 }
  0x66   :  { %925 = vst [vmem:[#allocation5 + $0x268] sm:$0xff] %v733_v44  ;;  %v745_v30 = vmul.f32 %v1149_v36, %v546_v15  ;;  %v550_v31 = vcvt.s32.f32 %v358_v18  ;;  %v169_v32 = vunpack.c.0.s8 %v1358_v20  ;;  %v746_v33 = vmul.f32 %v1149_v36, %v547_v22 }
  0x67   :  { %926 = vst [vmem:[#allocation5 + $0x270] sm:$0xff] %v734_v48  ;;  %v747_v34 = vmul.f32 %v1149_v36, %v548_v23  ;;  %v551_v19 = vcvt.s32.f32 %v359_v26  ;;  %v360_v35 = vand.u32 255, %v168_v27  ;;  %v170_v38 = vunpack.c.0.s8 %v1363_v28 }
  0x68   :  { %927 = vst [vmem:[#allocation5 + $0x278] sm:$0xff] %v735_v52  ;;  %v361_v37 = vand.u32 255, %v169_v32  ;;  %v171_v39 = vunpack.c.0.s8 %v1365_v29  ;;  %v172_v40 = vunpack.c.0.s8 %v1367_v24  ;;  %v748_v41 = vmul.f32 %v1149_v36, %v549_v25  ;;  %v1398_v25 = vld [vmem:[#allocation2 + $0xe0] sm:$0xff] }
  0x69   :  { %928 = vst [vmem:[#allocation5 + $0x280] sm:$0xff] %v736_v57  ;;  %v552_v42 = vcvt.s32.f32 %v360_v35  ;;  %v173_v43 = vunpack.c.1.s8 %v1358_v20  ;;  %v174_v44 = vunpack.c.1.s8 %v1363_v28  ;;  %v362_v46 = vand.u32 255, %v170_v38 }
  0x6a   :  { %929 = vst [vmem:[#allocation5 + $0x288] sm:$0xff] %v737_v58  ;;  %v553_v45 = vcvt.s32.f32 %v361_v37  ;;  %v363_v47 = vand.u32 255, %v171_v39  ;;  %v364_v48 = vand.u32 255, %v172_v40  ;;  %v749_v49 = vmul.f32 %v1149_v36, %v550_v31 }
  0x6b   :  { %930 = vst [vmem:[#allocation5 + $0x290] sm:$0xff] %v738_v62  ;;  %v365_v50 = vand.u32 255, %v173_v43  ;;  %v366_v51 = vand.u32 255, %v174_v44  ;;  %v175_v52 = vunpack.c.1.s8 %v1365_v29  ;;  %v750_v53 = vmul.f32 %v1149_v36, %v551_v19 }
  0x6c   :  { %931 = vst [vmem:[#allocation5 + $0x298] sm:$0xff] %v739_v55  ;;  %v554_v54 = vcvt.s32.f32 %v362_v46  ;;  %v555_v56 = vcvt.s32.f32 %v363_v47  ;;  %v556_v57 = vcvt.s32.f32 %v364_v48  ;;  %v751_v58 = vmul.f32 %v1149_v36, %v552_v42 }
  0x6d   :  { %932 = vst [vmem:[#allocation5 + $0x2a0] sm:$0xff] %v740_v7  ;;  %v557_v59 = vcvt.s32.f32 %v365_v50  ;;  %v367_v60 = vand.u32 255, %v175_v52  ;;  %v176_v62 = vunpack.c.1.s8 %v1367_v24  ;;  %v752_v55 = vmul.f32 %v1149_v36, %v553_v45 }
  0x6e   :  { %933 = vst [vmem:[#allocation5 + $0x2a8] sm:$0xff] %v741_v10  ;;  %v753_v63 = vmul.f32 %v1149_v36, %v554_v54  ;;  %v558_v0 = vcvt.s32.f32 %v366_v51  ;;  %v177_v3 = vunpack.c.2.s8 %v1358_v20  ;;  %v754_v5 = vmul.f32 %v1149_v36, %v555_v56 }
  0x6f   :  { %934 = vst [vmem:[#allocation5 + $0x2b0] sm:$0xff] %v742_v21  ;;  %v755_v61 = vmul.f32 %v1149_v36, %v556_v57  ;;  %v559_v6 = vcvt.s32.f32 %v367_v60  ;;  %v368_v7 = vand.u32 255, %v176_v62  ;;  %v178_v11 = vunpack.c.2.s8 %v1363_v28 }
  0x70   :  { %935 = vst [vmem:[#allocation5 + $0x2b8] sm:$0xff] %v743_v9  ;;  %v369_v8 = vand.u32 255, %v177_v3  ;;  %v179_v4 = vunpack.c.2.s8 %v1365_v29  ;;  %v180_v12 = vunpack.c.2.s8 %v1367_v24  ;;  %v756_v13 = vmul.f32 %v1149_v36, %v557_v59 }
  0x71   :  { %936 = vst [vmem:[#allocation5 + $0x2c0] sm:$0xff] %v744_v14  ;;  %v560_v2 = vcvt.s32.f32 %v368_v7  ;;  %v181_v16 = vunpack.c.3.s8 %v1358_v20  ;;  %v182_v10 = vunpack.c.3.s8 %v1363_v28  ;;  %v370_v18 = vand.u32 255, %v178_v11 }
  0x72   :  { %937 = vst [vmem:[#allocation5 + $0x2c8] sm:$0xff] %v745_v30  ;;  %v561_v17 = vcvt.s32.f32 %v369_v8  ;;  %v371_v1 = vand.u32 255, %v179_v4  ;;  %v372_v21 = vand.u32 255, %v180_v12  ;;  %v757_v15 = vmul.f32 %v1149_v36, %v558_v0 }
  0x73   :  { %938 = vst [vmem:[#allocation5 + $0x2d0] sm:$0xff] %v746_v33  ;;  %v373_v22 = vand.u32 255, %v181_v16  ;;  %v374_v23 = vand.u32 255, %v182_v10  ;;  %v183_v9 = vunpack.c.3.s8 %v1365_v29  ;;  %v758_v26 = vmul.f32 %v1149_v36, %v559_v6  ;;  %v1403_v33 = vld [vmem:[#allocation2 + $0xe8] sm:$0xff]  ;;  %v1407_v29 = vld [vmem:[#allocation2 + $0xf8] sm:$0xff] }
  0x74   :  { %939 = vst [vmem:[#allocation5 + $0x2d8] sm:$0xff] %v747_v34  ;;  %v562_v20 = vcvt.s32.f32 %v370_v18  ;;  %v563_v27 = vcvt.s32.f32 %v371_v1  ;;  %v564_v28 = vcvt.s32.f32 %v372_v21  ;;  %v759_v14 = vmul.f32 %v1149_v36, %v560_v2  ;;  %v1405_v34 = vld [vmem:[#allocation2 + $0xf0] sm:$0xff] }
  0x75   :  { %940 = vst [vmem:[#allocation5 + $0x2e0] sm:$0xff] %v748_v41  ;;  %v565_v30 = vcvt.s32.f32 %v373_v22  ;;  %v375_v31 = vand.u32 255, %v183_v9  ;;  %v184_v32 = vunpack.c.3.s8 %v1367_v24  ;;  %v760_v19 = vmul.f32 %v1149_v36, %v561_v17 }
  0x76   :  { %941 = vst [vmem:[#allocation5 + $0x2e8] sm:$0xff] %v749_v49  ;;  %v761_v35 = vmul.f32 %v1149_v36, %v562_v20  ;;  %v566_v37 = vcvt.s32.f32 %v374_v23  ;;  %v185_v38 = vunpack.c.0.s8 %v1398_v25  ;;  %v762_v39 = vmul.f32 %v1149_v36, %v563_v27 }
  0x77   :  { %942 = vst [vmem:[#allocation5 + $0x2f0] sm:$0xff] %v750_v53  ;;  %v763_v40 = vmul.f32 %v1149_v36, %v564_v28  ;;  %v567_v24 = vcvt.s32.f32 %v375_v31  ;;  %v376_v41 = vand.u32 255, %v184_v32  ;;  %v186_v43 = vunpack.c.0.s8 %v1403_v33 }
  0x78   :  { %943 = vst [vmem:[#allocation5 + $0x2f8] sm:$0xff] %v751_v58  ;;  %v377_v42 = vand.u32 255, %v185_v38  ;;  %v187_v44 = vunpack.c.0.s8 %v1405_v34  ;;  %v188_v45 = vunpack.c.0.s8 %v1407_v29  ;;  %v764_v46 = vmul.f32 %v1149_v36, %v565_v30  ;;  %v1438_v30 = vld [vmem:[#allocation2 + $0x100] sm:$0xff] }
  0x79   :  { %944 = vst [vmem:[#allocation5 + $0x300] sm:$0xff] %v752_v55  ;;  %v568_v47 = vcvt.s32.f32 %v376_v41  ;;  %v189_v48 = vunpack.c.1.s8 %v1398_v25  ;;  %v190_v49 = vunpack.c.1.s8 %v1403_v33  ;;  %v378_v51 = vand.u32 255, %v186_v43 }
  0x7a   :  { %945 = vst [vmem:[#allocation5 + $0x308] sm:$0xff] %v753_v63  ;;  %v569_v50 = vcvt.s32.f32 %v377_v42  ;;  %v379_v52 = vand.u32 255, %v187_v44  ;;  %v380_v53 = vand.u32 255, %v188_v45  ;;  %v765_v54 = vmul.f32 %v1149_v36, %v566_v37 }
  0x7b   :  { %946 = vst [vmem:[#allocation5 + $0x310] sm:$0xff] %v754_v5  ;;  %v381_v56 = vand.u32 255, %v189_v48  ;;  %v382_v57 = vand.u32 255, %v190_v49  ;;  %v191_v58 = vunpack.c.1.s8 %v1405_v34  ;;  %v766_v59 = vmul.f32 %v1149_v36, %v567_v24 }
  0x7c   :  { %947 = vst [vmem:[#allocation5 + $0x318] sm:$0xff] %v755_v61  ;;  %v570_v60 = vcvt.s32.f32 %v378_v51  ;;  %v571_v62 = vcvt.s32.f32 %v379_v52  ;;  %v572_v55 = vcvt.s32.f32 %v380_v53  ;;  %v767_v63 = vmul.f32 %v1149_v36, %v568_v47 }
  0x7d   :  { %948 = vst [vmem:[#allocation5 + $0x320] sm:$0xff] %v756_v13  ;;  %v573_v0 = vcvt.s32.f32 %v381_v56  ;;  %v383_v3 = vand.u32 255, %v191_v58  ;;  %v192_v5 = vunpack.c.1.s8 %v1407_v29  ;;  %v768_v61 = vmul.f32 %v1149_v36, %v569_v50 }
  0x7e   :  { %949 = vst [vmem:[#allocation5 + $0x328] sm:$0xff] %v757_v15  ;;  %v769_v6 = vmul.f32 %v1149_v36, %v570_v60  ;;  %v574_v7 = vcvt.s32.f32 %v382_v57  ;;  %v193_v8 = vunpack.c.2.s8 %v1398_v25  ;;  %v770_v11 = vmul.f32 %v1149_v36, %v571_v62 }
  0x7f   :  { %950 = vst [vmem:[#allocation5 + $0x330] sm:$0xff] %v758_v26  ;;  %v771_v4 = vmul.f32 %v1149_v36, %v572_v55  ;;  %v575_v12 = vcvt.s32.f32 %v383_v3  ;;  %v384_v13 = vand.u32 255, %v192_v5  ;;  %v194_v16 = vunpack.c.2.s8 %v1403_v33 }
  0x80   :  { %951 = vst [vmem:[#allocation5 + $0x338] sm:$0xff] %v759_v14  ;;  %v385_v2 = vand.u32 255, %v193_v8  ;;  %v195_v10 = vunpack.c.2.s8 %v1405_v34  ;;  %v196_v17 = vunpack.c.2.s8 %v1407_v29  ;;  %v772_v18 = vmul.f32 %v1149_v36, %v573_v0 }
  0x81   :  { %952 = vst [vmem:[#allocation5 + $0x340] sm:$0xff] %v760_v19  ;;  %v576_v1 = vcvt.s32.f32 %v384_v13  ;;  %v197_v21 = vunpack.c.3.s8 %v1398_v25  ;;  %v198_v15 = vunpack.c.3.s8 %v1403_v33  ;;  %v386_v23 = vand.u32 255, %v194_v16 }
  0x82   :  { %953 = vst [vmem:[#allocation5 + $0x348] sm:$0xff] %v761_v35  ;;  %v577_v22 = vcvt.s32.f32 %v385_v2  ;;  %v387_v9 = vand.u32 255, %v195_v10  ;;  %v388_v26 = vand.u32 255, %v196_v17  ;;  %v773_v20 = vmul.f32 %v1149_v36, %v574_v7 }
  0x83   :  { %954 = vst [vmem:[#allocation5 + $0x350] sm:$0xff] %v762_v39  ;;  %v389_v27 = vand.u32 255, %v197_v21  ;;  %v390_v28 = vand.u32 255, %v198_v15  ;;  %v199_v14 = vunpack.c.3.s8 %v1405_v34  ;;  %v774_v31 = vmul.f32 %v1149_v36, %v575_v12  ;;  %v1443_v39 = vld [vmem:[#allocation2 + $0x108] sm:$0xff]  ;;  %v1447_v34 = vld [vmem:[#allocation2 + $0x118] sm:$0xff] }
  0x84   :  { %955 = vst [vmem:[#allocation5 + $0x358] sm:$0xff] %v763_v40  ;;  %v578_v25 = vcvt.s32.f32 %v386_v23  ;;  %v579_v32 = vcvt.s32.f32 %v387_v9  ;;  %v580_v33 = vcvt.s32.f32 %v388_v26  ;;  %v775_v19 = vmul.f32 %v1149_v36, %v576_v1  ;;  %v1445_v40 = vld [vmem:[#allocation2 + $0x110] sm:$0xff] }
  0x85   :  { %956 = vst [vmem:[#allocation5 + $0x360] sm:$0xff] %v764_v46  ;;  %v581_v35 = vcvt.s32.f32 %v389_v27  ;;  %v391_v37 = vand.u32 255, %v199_v14  ;;  %v200_v38 = vunpack.c.3.s8 %v1407_v29  ;;  %v776_v24 = vmul.f32 %v1149_v36, %v577_v22 }
  0x86   :  { %957 = vst [vmem:[#allocation5 + $0x368] sm:$0xff] %v765_v54  ;;  %v777_v41 = vmul.f32 %v1149_v36, %v578_v25  ;;  %v582_v42 = vcvt.s32.f32 %v390_v28  ;;  %v201_v43 = vunpack.c.0.s8 %v1438_v30  ;;  %v778_v44 = vmul.f32 %v1149_v36, %v579_v32 }
  0x87   :  { %958 = vst [vmem:[#allocation5 + $0x370] sm:$0xff] %v766_v59  ;;  %v779_v45 = vmul.f32 %v1149_v36, %v580_v33  ;;  %v583_v29 = vcvt.s32.f32 %v391_v37  ;;  %v392_v46 = vand.u32 255, %v200_v38  ;;  %v202_v48 = vunpack.c.0.s8 %v1443_v39 }
  0x88   :  { %959 = vst [vmem:[#allocation5 + $0x378] sm:$0xff] %v767_v63  ;;  %v393_v47 = vand.u32 255, %v201_v43  ;;  %v203_v49 = vunpack.c.0.s8 %v1445_v40  ;;  %v204_v50 = vunpack.c.0.s8 %v1447_v34  ;;  %v780_v51 = vmul.f32 %v1149_v36, %v581_v35  ;;  %v1478_v35 = vld [vmem:[#allocation2 + $0x120] sm:$0xff] }
  0x89   :  { %960 = vst [vmem:[#allocation5 + $0x380] sm:$0xff] %v768_v61  ;;  %v584_v52 = vcvt.s32.f32 %v392_v46  ;;  %v205_v53 = vunpack.c.1.s8 %v1438_v30  ;;  %v206_v54 = vunpack.c.1.s8 %v1443_v39  ;;  %v394_v57 = vand.u32 255, %v202_v48 }
  0x8a   :  { %961 = vst [vmem:[#allocation5 + $0x388] sm:$0xff] %v769_v6  ;;  %v585_v56 = vcvt.s32.f32 %v393_v47  ;;  %v395_v58 = vand.u32 255, %v203_v49  ;;  %v396_v59 = vand.u32 255, %v204_v50  ;;  %v781_v60 = vmul.f32 %v1149_v36, %v582_v42 }
  0x8b   :  { %962 = vst [vmem:[#allocation5 + $0x390] sm:$0xff] %v770_v11  ;;  %v397_v62 = vand.u32 255, %v205_v53  ;;  %v398_v55 = vand.u32 255, %v206_v54  ;;  %v207_v63 = vunpack.c.1.s8 %v1445_v40  ;;  %v782_v0 = vmul.f32 %v1149_v36, %v583_v29 }
  0x8c   :  { %963 = vst [vmem:[#allocation5 + $0x398] sm:$0xff] %v771_v4  ;;  %v586_v3 = vcvt.s32.f32 %v394_v57  ;;  %v587_v5 = vcvt.s32.f32 %v395_v58  ;;  %v588_v61 = vcvt.s32.f32 %v396_v59  ;;  %v783_v6 = vmul.f32 %v1149_v36, %v584_v52 }
  0x8d   :  { %964 = vst [vmem:[#allocation5 + $0x3a0] sm:$0xff] %v772_v18  ;;  %v589_v7 = vcvt.s32.f32 %v397_v62  ;;  %v399_v8 = vand.u32 255, %v207_v63  ;;  %v208_v11 = vunpack.c.1.s8 %v1447_v34  ;;  %v784_v4 = vmul.f32 %v1149_v36, %v585_v56 }
  0x8e   :  { %965 = vst [vmem:[#allocation5 + $0x3a8] sm:$0xff] %v773_v20  ;;  %v785_v12 = vmul.f32 %v1149_v36, %v586_v3  ;;  %v590_v13 = vcvt.s32.f32 %v398_v55  ;;  %v209_v2 = vunpack.c.2.s8 %v1438_v30  ;;  %v786_v16 = vmul.f32 %v1149_v36, %v587_v5 }
  0x8f   :  { %966 = vst [vmem:[#allocation5 + $0x3b0] sm:$0xff] %v774_v31  ;;  %v787_v10 = vmul.f32 %v1149_v36, %v588_v61  ;;  %v591_v17 = vcvt.s32.f32 %v399_v8  ;;  %v400_v18 = vand.u32 255, %v208_v11  ;;  %v210_v21 = vunpack.c.2.s8 %v1443_v39 }
  0x90   :  { %967 = vst [vmem:[#allocation5 + $0x3b8] sm:$0xff] %v775_v19  ;;  %v401_v1 = vand.u32 255, %v209_v2  ;;  %v211_v15 = vunpack.c.2.s8 %v1445_v40  ;;  %v212_v22 = vunpack.c.2.s8 %v1447_v34  ;;  %v788_v23 = vmul.f32 %v1149_v36, %v589_v7 }
  0x91   :  { %968 = vst [vmem:[#allocation5 + $0x3c0] sm:$0xff] %v776_v24  ;;  %v592_v9 = vcvt.s32.f32 %v400_v18  ;;  %v213_v26 = vunpack.c.3.s8 %v1438_v30  ;;  %v214_v20 = vunpack.c.3.s8 %v1443_v39  ;;  %v402_v28 = vand.u32 255, %v210_v21 }
  0x92   :  { %969 = vst [vmem:[#allocation5 + $0x3c8] sm:$0xff] %v777_v41  ;;  %v593_v27 = vcvt.s32.f32 %v401_v1  ;;  %v403_v14 = vand.u32 255, %v211_v15  ;;  %v404_v31 = vand.u32 255, %v212_v22  ;;  %v789_v25 = vmul.f32 %v1149_v36, %v590_v13 }
  0x93   :  { %970 = vst [vmem:[#allocation5 + $0x3d0] sm:$0xff] %v778_v44  ;;  %v405_v32 = vand.u32 255, %v213_v26  ;;  %v406_v33 = vand.u32 255, %v214_v20  ;;  %v215_v19 = vunpack.c.3.s8 %v1445_v40  ;;  %v790_v37 = vmul.f32 %v1149_v36, %v591_v17  ;;  %v1483_v44 = vld [vmem:[#allocation2 + $0x128] sm:$0xff]  ;;  %v1487_v40 = vld [vmem:[#allocation2 + $0x138] sm:$0xff] }
  0x94   :  { %971 = vst [vmem:[#allocation5 + $0x3d8] sm:$0xff] %v779_v45  ;;  %v594_v30 = vcvt.s32.f32 %v402_v28  ;;  %v595_v38 = vcvt.s32.f32 %v403_v14  ;;  %v596_v39 = vcvt.s32.f32 %v404_v31  ;;  %v791_v24 = vmul.f32 %v1149_v36, %v592_v9  ;;  %v1485_v45 = vld [vmem:[#allocation2 + $0x130] sm:$0xff] }
  0x95   :  { %972 = vst [vmem:[#allocation5 + $0x3e0] sm:$0xff] %v780_v51  ;;  %v597_v41 = vcvt.s32.f32 %v405_v32  ;;  %v407_v42 = vand.u32 255, %v215_v19  ;;  %v216_v43 = vunpack.c.3.s8 %v1447_v34  ;;  %v792_v29 = vmul.f32 %v1149_v36, %v593_v27 }
  0x96   :  { %973 = vst [vmem:[#allocation5 + $0x3e8] sm:$0xff] %v781_v60  ;;  %v793_v46 = vmul.f32 %v1149_v36, %v594_v30  ;;  %v598_v47 = vcvt.s32.f32 %v406_v33  ;;  %v217_v48 = vunpack.c.0.s8 %v1478_v35  ;;  %v794_v49 = vmul.f32 %v1149_v36, %v595_v38 }
  0x97   :  { %974 = vst [vmem:[#allocation5 + $0x3f0] sm:$0xff] %v782_v0  ;;  %v795_v50 = vmul.f32 %v1149_v36, %v596_v39  ;;  %v599_v34 = vcvt.s32.f32 %v407_v42  ;;  %v408_v51 = vand.u32 255, %v216_v43  ;;  %v218_v53 = vunpack.c.0.s8 %v1483_v44 }
  0x98   :  { %975 = vst [vmem:[#allocation5 + $0x3f8] sm:$0xff] %v783_v6  ;;  %v409_v52 = vand.u32 255, %v217_v48  ;;  %v219_v54 = vunpack.c.0.s8 %v1485_v45  ;;  %v220_v56 = vunpack.c.0.s8 %v1487_v40  ;;  %v796_v57 = vmul.f32 %v1149_v36, %v597_v41  ;;  %v1518_v41 = vld [vmem:[#allocation2 + $0x140] sm:$0xff] }
  0x99   :  { %976 = vst [vmem:[#allocation5 + $0x400] sm:$0xff] %v784_v4  ;;  %v600_v58 = vcvt.s32.f32 %v408_v51  ;;  %v221_v59 = vunpack.c.1.s8 %v1478_v35  ;;  %v222_v60 = vunpack.c.1.s8 %v1483_v44  ;;  %v410_v55 = vand.u32 255, %v218_v53 }
  0x9a   :  { %977 = vst [vmem:[#allocation5 + $0x408] sm:$0xff] %v785_v12  ;;  %v601_v62 = vcvt.s32.f32 %v409_v52  ;;  %v411_v63 = vand.u32 255, %v219_v54  ;;  %v412_v0 = vand.u32 255, %v220_v56  ;;  %v797_v3 = vmul.f32 %v1149_v36, %v598_v47 }
  0x9b   :  { %978 = vst [vmem:[#allocation5 + $0x410] sm:$0xff] %v786_v16  ;;  %v413_v5 = vand.u32 255, %v221_v59  ;;  %v414_v61 = vand.u32 255, %v222_v60  ;;  %v223_v6 = vunpack.c.1.s8 %v1485_v45  ;;  %v798_v7 = vmul.f32 %v1149_v36, %v599_v34 }
  0x9c   :  { %979 = vst [vmem:[#allocation5 + $0x418] sm:$0xff] %v787_v10  ;;  %v602_v8 = vcvt.s32.f32 %v410_v55  ;;  %v603_v11 = vcvt.s32.f32 %v411_v63  ;;  %v604_v4 = vcvt.s32.f32 %v412_v0  ;;  %v799_v12 = vmul.f32 %v1149_v36, %v600_v58 }
  0x9d   :  { %980 = vst [vmem:[#allocation5 + $0x420] sm:$0xff] %v788_v23  ;;  %v605_v13 = vcvt.s32.f32 %v413_v5  ;;  %v415_v2 = vand.u32 255, %v223_v6  ;;  %v224_v16 = vunpack.c.1.s8 %v1487_v40  ;;  %v800_v10 = vmul.f32 %v1149_v36, %v601_v62 }
  0x9e   :  { %981 = vst [vmem:[#allocation5 + $0x428] sm:$0xff] %v789_v25  ;;  %v801_v17 = vmul.f32 %v1149_v36, %v602_v8  ;;  %v606_v18 = vcvt.s32.f32 %v414_v61  ;;  %v225_v1 = vunpack.c.2.s8 %v1478_v35  ;;  %v802_v21 = vmul.f32 %v1149_v36, %v603_v11 }
  0x9f   :  { %982 = vst [vmem:[#allocation5 + $0x430] sm:$0xff] %v790_v37  ;;  %v803_v15 = vmul.f32 %v1149_v36, %v604_v4  ;;  %v607_v22 = vcvt.s32.f32 %v415_v2  ;;  %v416_v23 = vand.u32 255, %v224_v16  ;;  %v226_v26 = vunpack.c.2.s8 %v1483_v44 }
  0xa0   :  { %983 = vst [vmem:[#allocation5 + $0x438] sm:$0xff] %v791_v24  ;;  %v417_v9 = vand.u32 255, %v225_v1  ;;  %v227_v20 = vunpack.c.2.s8 %v1485_v45  ;;  %v228_v27 = vunpack.c.2.s8 %v1487_v40  ;;  %v804_v28 = vmul.f32 %v1149_v36, %v605_v13 }
  0xa1   :  { %984 = vst [vmem:[#allocation5 + $0x440] sm:$0xff] %v792_v29  ;;  %v608_v14 = vcvt.s32.f32 %v416_v23  ;;  %v229_v31 = vunpack.c.3.s8 %v1478_v35  ;;  %v230_v25 = vunpack.c.3.s8 %v1483_v44  ;;  %v418_v33 = vand.u32 255, %v226_v26 }
  0xa2   :  { %985 = vst [vmem:[#allocation5 + $0x448] sm:$0xff] %v793_v46  ;;  %v609_v32 = vcvt.s32.f32 %v417_v9  ;;  %v419_v19 = vand.u32 255, %v227_v20  ;;  %v420_v37 = vand.u32 255, %v228_v27  ;;  %v805_v30 = vmul.f32 %v1149_v36, %v606_v18 }
  0xa3   :  { %986 = vst [vmem:[#allocation5 + $0x450] sm:$0xff] %v794_v49  ;;  %v421_v38 = vand.u32 255, %v229_v31  ;;  %v422_v39 = vand.u32 255, %v230_v25  ;;  %v231_v24 = vunpack.c.3.s8 %v1485_v45  ;;  %v806_v42 = vmul.f32 %v1149_v36, %v607_v22  ;;  %v1523_v49 = vld [vmem:[#allocation2 + $0x148] sm:$0xff]  ;;  %v1527_v45 = vld [vmem:[#allocation2 + $0x158] sm:$0xff] }
  0xa4   :  { %987 = vst [vmem:[#allocation5 + $0x458] sm:$0xff] %v795_v50  ;;  %v610_v35 = vcvt.s32.f32 %v418_v33  ;;  %v611_v43 = vcvt.s32.f32 %v419_v19  ;;  %v612_v44 = vcvt.s32.f32 %v420_v37  ;;  %v807_v29 = vmul.f32 %v1149_v36, %v608_v14  ;;  %v1525_v50 = vld [vmem:[#allocation2 + $0x150] sm:$0xff] }
  0xa5   :  { %988 = vst [vmem:[#allocation5 + $0x460] sm:$0xff] %v796_v57  ;;  %v613_v46 = vcvt.s32.f32 %v421_v38  ;;  %v423_v47 = vand.u32 255, %v231_v24  ;;  %v232_v48 = vunpack.c.3.s8 %v1487_v40  ;;  %v808_v34 = vmul.f32 %v1149_v36, %v609_v32 }
  0xa6   :  { %989 = vst [vmem:[#allocation5 + $0x468] sm:$0xff] %v797_v3  ;;  %v809_v51 = vmul.f32 %v1149_v36, %v610_v35  ;;  %v614_v52 = vcvt.s32.f32 %v422_v39  ;;  %v233_v53 = vunpack.c.0.s8 %v1518_v41  ;;  %v810_v54 = vmul.f32 %v1149_v36, %v611_v43 }
  0xa7   :  { %990 = vst [vmem:[#allocation5 + $0x470] sm:$0xff] %v798_v7  ;;  %v811_v56 = vmul.f32 %v1149_v36, %v612_v44  ;;  %v615_v40 = vcvt.s32.f32 %v423_v47  ;;  %v424_v57 = vand.u32 255, %v232_v48  ;;  %v234_v59 = vunpack.c.0.s8 %v1523_v49 }
  0xa8   :  { %991 = vst [vmem:[#allocation5 + $0x478] sm:$0xff] %v799_v12  ;;  %v425_v58 = vand.u32 255, %v233_v53  ;;  %v235_v60 = vunpack.c.0.s8 %v1525_v50  ;;  %v236_v62 = vunpack.c.0.s8 %v1527_v45  ;;  %v812_v55 = vmul.f32 %v1149_v36, %v613_v46  ;;  %v1558_v46 = vld [vmem:[#allocation2 + $0x160] sm:$0xff] }
  0xa9   :  { %992 = vst [vmem:[#allocation5 + $0x480] sm:$0xff] %v800_v10  ;;  %v616_v63 = vcvt.s32.f32 %v424_v57  ;;  %v237_v0 = vunpack.c.1.s8 %v1518_v41  ;;  %v238_v3 = vunpack.c.1.s8 %v1523_v49  ;;  %v426_v61 = vand.u32 255, %v234_v59 }
  0xaa   :  { %993 = vst [vmem:[#allocation5 + $0x488] sm:$0xff] %v801_v17  ;;  %v617_v5 = vcvt.s32.f32 %v425_v58  ;;  %v427_v6 = vand.u32 255, %v235_v60  ;;  %v428_v7 = vand.u32 255, %v236_v62  ;;  %v813_v8 = vmul.f32 %v1149_v36, %v614_v52 }
  0xab   :  { %994 = vst [vmem:[#allocation5 + $0x490] sm:$0xff] %v802_v21  ;;  %v429_v11 = vand.u32 255, %v237_v0  ;;  %v430_v4 = vand.u32 255, %v238_v3  ;;  %v239_v12 = vunpack.c.1.s8 %v1525_v50  ;;  %v814_v13 = vmul.f32 %v1149_v36, %v615_v40 }
  0xac   :  { %995 = vst [vmem:[#allocation5 + $0x498] sm:$0xff] %v803_v15  ;;  %v618_v2 = vcvt.s32.f32 %v426_v61  ;;  %v619_v16 = vcvt.s32.f32 %v427_v6  ;;  %v620_v10 = vcvt.s32.f32 %v428_v7  ;;  %v815_v17 = vmul.f32 %v1149_v36, %v616_v63 }
  0xad   :  { %996 = vst [vmem:[#allocation5 + $0x4a0] sm:$0xff] %v804_v28  ;;  %v621_v18 = vcvt.s32.f32 %v429_v11  ;;  %v431_v1 = vand.u32 255, %v239_v12  ;;  %v240_v21 = vunpack.c.1.s8 %v1527_v45  ;;  %v816_v15 = vmul.f32 %v1149_v36, %v617_v5 }
  0xae   :  { %997 = vst [vmem:[#allocation5 + $0x4a8] sm:$0xff] %v805_v30  ;;  %v817_v22 = vmul.f32 %v1149_v36, %v618_v2  ;;  %v622_v23 = vcvt.s32.f32 %v430_v4  ;;  %v241_v9 = vunpack.c.2.s8 %v1518_v41  ;;  %v818_v26 = vmul.f32 %v1149_v36, %v619_v16 }
  0xaf   :  { %998 = vst [vmem:[#allocation5 + $0x4b0] sm:$0xff] %v806_v42  ;;  %v819_v20 = vmul.f32 %v1149_v36, %v620_v10  ;;  %v623_v27 = vcvt.s32.f32 %v431_v1  ;;  %v432_v28 = vand.u32 255, %v240_v21  ;;  %v242_v31 = vunpack.c.2.s8 %v1523_v49 }
  0xb0   :  { %999 = vst [vmem:[#allocation5 + $0x4b8] sm:$0xff] %v807_v29  ;;  %v433_v14 = vand.u32 255, %v241_v9  ;;  %v243_v25 = vunpack.c.2.s8 %v1525_v50  ;;  %v244_v32 = vunpack.c.2.s8 %v1527_v45  ;;  %v820_v33 = vmul.f32 %v1149_v36, %v621_v18 }
  0xb1   :  { %1000 = vst [vmem:[#allocation5 + $0x4c0] sm:$0xff] %v808_v34  ;;  %v624_v19 = vcvt.s32.f32 %v432_v28  ;;  %v245_v37 = vunpack.c.3.s8 %v1518_v41  ;;  %v246_v30 = vunpack.c.3.s8 %v1523_v49  ;;  %v434_v39 = vand.u32 255, %v242_v31 }
  0xb2   :  { %1001 = vst [vmem:[#allocation5 + $0x4c8] sm:$0xff] %v809_v51  ;;  %v625_v38 = vcvt.s32.f32 %v433_v14  ;;  %v435_v24 = vand.u32 255, %v243_v25  ;;  %v436_v42 = vand.u32 255, %v244_v32  ;;  %v821_v35 = vmul.f32 %v1149_v36, %v622_v23 }
  0xb3   :  { %1002 = vst [vmem:[#allocation5 + $0x4d0] sm:$0xff] %v810_v54  ;;  %v437_v43 = vand.u32 255, %v245_v37  ;;  %v438_v44 = vand.u32 255, %v246_v30  ;;  %v247_v29 = vunpack.c.3.s8 %v1525_v50  ;;  %v822_v47 = vmul.f32 %v1149_v36, %v623_v27  ;;  %v1563_v54 = vld [vmem:[#allocation2 + $0x168] sm:$0xff]  ;;  %v1567_v50 = vld [vmem:[#allocation2 + $0x178] sm:$0xff] }
  0xb4   :  { %1003 = vst [vmem:[#allocation5 + $0x4d8] sm:$0xff] %v811_v56  ;;  %v626_v41 = vcvt.s32.f32 %v434_v39  ;;  %v627_v48 = vcvt.s32.f32 %v435_v24  ;;  %v628_v49 = vcvt.s32.f32 %v436_v42  ;;  %v823_v34 = vmul.f32 %v1149_v36, %v624_v19  ;;  %v1565_v56 = vld [vmem:[#allocation2 + $0x170] sm:$0xff] }
  0xb5   :  { %1004 = vst [vmem:[#allocation5 + $0x4e0] sm:$0xff] %v812_v55  ;;  %v629_v51 = vcvt.s32.f32 %v437_v43  ;;  %v439_v52 = vand.u32 255, %v247_v29  ;;  %v248_v53 = vunpack.c.3.s8 %v1527_v45  ;;  %v824_v40 = vmul.f32 %v1149_v36, %v625_v38 }
  0xb6   :  { %1005 = vst [vmem:[#allocation5 + $0x4e8] sm:$0xff] %v813_v8  ;;  %v825_v57 = vmul.f32 %v1149_v36, %v626_v41  ;;  %v630_v58 = vcvt.s32.f32 %v438_v44  ;;  %v249_v59 = vunpack.c.0.s8 %v1558_v46  ;;  %v826_v60 = vmul.f32 %v1149_v36, %v627_v48 }
  0xb7   :  { %1006 = vst [vmem:[#allocation5 + $0x4f0] sm:$0xff] %v814_v13  ;;  %v827_v62 = vmul.f32 %v1149_v36, %v628_v49  ;;  %v631_v45 = vcvt.s32.f32 %v439_v52  ;;  %v440_v55 = vand.u32 255, %v248_v53  ;;  %v250_v0 = vunpack.c.0.s8 %v1563_v54 }
  0xb8   :  { %1007 = vst [vmem:[#allocation5 + $0x4f8] sm:$0xff] %v815_v17  ;;  %v441_v63 = vand.u32 255, %v249_v59  ;;  %v251_v3 = vunpack.c.0.s8 %v1565_v56  ;;  %v252_v5 = vunpack.c.0.s8 %v1567_v50  ;;  %v828_v61 = vmul.f32 %v1149_v36, %v629_v51 }
  0xb9   :  { %1008 = vst [vmem:[#allocation5 + $0x500] sm:$0xff] %v816_v15  ;;  %v632_v6 = vcvt.s32.f32 %v440_v55  ;;  %v253_v7 = vunpack.c.1.s8 %v1558_v46  ;;  %v254_v8 = vunpack.c.1.s8 %v1563_v54  ;;  %v442_v4 = vand.u32 255, %v250_v0 }
  0xba   :  { %1009 = vst [vmem:[#allocation5 + $0x508] sm:$0xff] %v817_v22  ;;  %v633_v11 = vcvt.s32.f32 %v441_v63  ;;  %v443_v12 = vand.u32 255, %v251_v3  ;;  %v444_v13 = vand.u32 255, %v252_v5  ;;  %v829_v2 = vmul.f32 %v1149_v36, %v630_v58 }
  0xbb   :  { %1010 = vst [vmem:[#allocation5 + $0x510] sm:$0xff] %v818_v26  ;;  %v445_v16 = vand.u32 255, %v253_v7  ;;  %v446_v10 = vand.u32 255, %v254_v8  ;;  %v255_v17 = vunpack.c.1.s8 %v1565_v56  ;;  %v830_v18 = vmul.f32 %v1149_v36, %v631_v45 }
  0xbc   :  { %1011 = vst [vmem:[#allocation5 + $0x518] sm:$0xff] %v819_v20  ;;  %v634_v1 = vcvt.s32.f32 %v442_v4  ;;  %v635_v21 = vcvt.s32.f32 %v443_v12  ;;  %v636_v15 = vcvt.s32.f32 %v444_v13  ;;  %v831_v22 = vmul.f32 %v1149_v36, %v632_v6 }
  0xbd   :  { %1012 = vst [vmem:[#allocation5 + $0x520] sm:$0xff] %v820_v33  ;;  %v637_v23 = vcvt.s32.f32 %v445_v16  ;;  %v447_v9 = vand.u32 255, %v255_v17  ;;  %v256_v26 = vunpack.c.1.s8 %v1567_v50  ;;  %v832_v20 = vmul.f32 %v1149_v36, %v633_v11 }
  0xbe   :  { %1013 = vst [vmem:[#allocation5 + $0x528] sm:$0xff] %v821_v35  ;;  %v833_v27 = vmul.f32 %v1149_v36, %v634_v1  ;;  %v638_v28 = vcvt.s32.f32 %v446_v10  ;;  %v257_v14 = vunpack.c.2.s8 %v1558_v46  ;;  %v834_v31 = vmul.f32 %v1149_v36, %v635_v21 }
  0xbf   :  { %1014 = vst [vmem:[#allocation5 + $0x530] sm:$0xff] %v822_v47  ;;  %v835_v25 = vmul.f32 %v1149_v36, %v636_v15  ;;  %v639_v32 = vcvt.s32.f32 %v447_v9  ;;  %v448_v33 = vand.u32 255, %v256_v26  ;;  %v258_v37 = vunpack.c.2.s8 %v1563_v54 }
  0xc0   :  { %1015 = vst [vmem:[#allocation5 + $0x538] sm:$0xff] %v823_v34  ;;  %v449_v19 = vand.u32 255, %v257_v14  ;;  %v259_v30 = vunpack.c.2.s8 %v1565_v56  ;;  %v260_v38 = vunpack.c.2.s8 %v1567_v50  ;;  %v836_v39 = vmul.f32 %v1149_v36, %v637_v23 }
  0xc1   :  { %1016 = vst [vmem:[#allocation5 + $0x540] sm:$0xff] %v824_v40  ;;  %v640_v24 = vcvt.s32.f32 %v448_v33  ;;  %v261_v42 = vunpack.c.3.s8 %v1558_v46  ;;  %v262_v35 = vunpack.c.3.s8 %v1563_v54  ;;  %v450_v44 = vand.u32 255, %v258_v37 }
  0xc2   :  { %1017 = vst [vmem:[#allocation5 + $0x548] sm:$0xff] %v825_v57  ;;  %v641_v43 = vcvt.s32.f32 %v449_v19  ;;  %v451_v29 = vand.u32 255, %v259_v30  ;;  %v452_v47 = vand.u32 255, %v260_v38  ;;  %v837_v41 = vmul.f32 %v1149_v36, %v638_v28 }
  0xc3   :  { %1018 = vst [vmem:[#allocation5 + $0x550] sm:$0xff] %v826_v60  ;;  %v453_v48 = vand.u32 255, %v261_v42  ;;  %v454_v49 = vand.u32 255, %v262_v35  ;;  %v263_v34 = vunpack.c.3.s8 %v1565_v56  ;;  %v838_v51 = vmul.f32 %v1149_v36, %v639_v32 }
  0xc4   :  { %1019 = vst [vmem:[#allocation5 + $0x558] sm:$0xff] %v827_v62  ;;  %v642_v52 = vcvt.s32.f32 %v450_v44  ;;  %v643_v53 = vcvt.s32.f32 %v451_v29  ;;  %v839_v46 = vmul.f32 %v1149_v36, %v640_v24  ;;  %v644_v54 = vcvt.s32.f32 %v452_v47 }
  0xc5   :  { %1020 = vst [vmem:[#allocation5 + $0x560] sm:$0xff] %v828_v61  ;;  %v455_v40 = vand.u32 255, %v263_v34  ;;  %v264_v57 = vunpack.c.3.s8 %v1567_v50  ;;  %v840_v58 = vmul.f32 %v1149_v36, %v641_v43  ;;  %v645_v59 = vcvt.s32.f32 %v453_v48 }
  0xc6   :  { %1021 = vst [vmem:[#allocation5 + $0x568] sm:$0xff] %v829_v2  ;;  %v841_v60 = vmul.f32 %v1149_v36, %v642_v52  ;;  %v646_v56 = vcvt.s32.f32 %v454_v49  ;;  %v842_v45 = vmul.f32 %v1149_v36, %v643_v53  ;;  %v843_v63 = vmul.f32 %v1149_v36, %v644_v54 }
  0xc7   :  { %1022 = vst [vmem:[#allocation5 + $0x570] sm:$0xff] %v830_v18  ;;  %v456_v62 = vand.u32 255, %v264_v57  ;;  %v647_v55 = vcvt.s32.f32 %v455_v40  ;;  %v844_v50 = vmul.f32 %v1149_v36, %v645_v59 }
  0xc8   :  { %1023 = vst [vmem:[#allocation5 + $0x578] sm:$0xff] %v831_v22  ;;  %v845_v3 = vmul.f32 %v1149_v36, %v646_v56 }
  0xc9   :  { %1024 = vst [vmem:[#allocation5 + $0x580] sm:$0xff] %v832_v20  ;;  %v648_v0 = vcvt.s32.f32 %v456_v62  ;;  %v846_v5 = vmul.f32 %v1149_v36, %v647_v55 }
  0xca   :  { %1025 = vst [vmem:[#allocation5 + $0x588] sm:$0xff] %v833_v27 }
  0xcb   :  { %1026 = vst [vmem:[#allocation5 + $0x590] sm:$0xff] %v834_v31  ;;  %v847_v61 = vmul.f32 %v1149_v36, %v648_v0 }
  0xcc   :  { %1027 = vst [vmem:[#allocation5 + $0x598] sm:$0xff] %v835_v25 }
  0xcd   :  { %1028 = vst [vmem:[#allocation5 + $0x5a0] sm:$0xff] %v836_v39 }
  0xce   :  { %1029 = vst [vmem:[#allocation5 + $0x5a8] sm:$0xff] %v837_v41 }
  0xcf   :  { %1030 = vst [vmem:[#allocation5 + $0x5b0] sm:$0xff] %v838_v51 }
  0xd0   :  { %1031 = vst [vmem:[#allocation5 + $0x5b8] sm:$0xff] %v839_v46 }
  0xd1   :  { %1032 = vst [vmem:[#allocation5 + $0x5c0] sm:$0xff] %v840_v58 }
  0xd2   :  { %1033 = vst [vmem:[#allocation5 + $0x5c8] sm:$0xff] %v841_v60 }
  0xd3   :  { %1034 = vst [vmem:[#allocation5 + $0x5d0] sm:$0xff] %v842_v45 }
  0xd4   :  { %1035 = vst [vmem:[#allocation5 + $0x5d8] sm:$0xff] %v843_v63 }
  0xd5   :  { %1036 = vst [vmem:[#allocation5 + $0x5e0] sm:$0xff] %v844_v50 }
  0xd6   :  { %1037 = vst [vmem:[#allocation5 + $0x5e8] sm:$0xff] %v845_v3 }
  0xd7   :  { %1038 = vst [vmem:[#allocation5 + $0x5f0] sm:$0xff] %v846_v5 }
  0xd8   :  { %1039 = vst [vmem:[#allocation5 + $0x5f8] sm:$0xff] %v847_v61 }
  0xd9   :  { %1052 = dma.vmem_to_hbm [thread:$0]  %s1045_s13, 24576, %s1047_s16, [#allocation4], %s1119_s11, %s1119_s11, %s1120_s12  }
  0xda   :  { %1116 = dma.done.wait [#allocation4], 24576  }
  0xdb   :  { %1117 = vsyncadd [#allocation4], 4294942720 }
  0xdc   :  { %1057 = vsyncpa [#allocation3], 1 }
  0xdd   :  { %1058 = vsyncpa [#allocation4], 1 }

</bundles_post_ra>
